<compile_context>
chip_gen: v5e
topology: v5e:2x2
jax: 0.10.0
libtpu: 0.0.40
codegen_flags: <defaults>
</compile_context>

<pallas_src>
import math

import jax
import jax.numpy as jnp
from jax.experimental import pallas as pl
from jax.experimental.pallas import tpu as pltpu

LANES = 128
SUBLANES = 8
MIN_TILE_ELEMS = SUBLANES * LANES          # 1024
ACC_ROWS_MAX = 64                          # 8 independent (8,128) f32 accumulators
CHUNK_ROWS = 256                           # rows per fori_loop slice (bounded vregs)
NUM_SPLITS = 2                             # leading "parallel" axis (v7x: 2 TCs)
TARGET_BLOCK_BYTES = 4 * 1024 * 1024       # ~4 MiB per input block per grid step


def _round_down(x, m):
    return (x // m) * m


def _make_mse_sum_kernel(block_rows, chunk_rows, acc_rows, blocks_per_split,
                         valid_rows, mask_from_block, any_mask):
    num_chunks = block_rows // chunk_rows
    sub_groups = chunk_rows // acc_rows

    def kernel(pred_ref, target_ref, out_ref):
        # Output block index depends only on the parallel axis, so the tile is
        # resident across the inner "arbitrary" axis: zero it on the first
        # inner step and accumulate straight into it (no VMEM scratch copy).
        @pl.when(pl.program_id(1) == 0)
        def _():
            out_ref[...] = jnp.zeros_like(out_ref)

        # Global (unclamped) block id along the row range.
        b = pl.program_id(0) * blocks_per_split + pl.program_id(1)

        def block_sum(masked):
            def chunk_body(ci, acc):
                r0 = pl.multiple_of(ci * chunk_rows, chunk_rows)
                p = pred_ref[pl.ds(r0, chunk_rows), :].astype(jnp.float32)
                t = target_ref[pl.ds(r0, chunk_rows), :].astype(jnp.float32)
                d = p - t
                sq = d * d
                if masked:
                    ridx = (b * block_rows + r0
                            + jax.lax.broadcasted_iota(jnp.int32, sq.shape, 0))
                    # Select AFTER squaring: edge-block VMEM contents are
                    # undefined (possibly NaN/Inf); 0 * NaN would poison the
                    # sum, jnp.where is safe.
                    sq = jnp.where(ridx < valid_rows, sq, 0.0)
                # (chunk,128) -> (sub_groups, acc_rows, 128): leading-dim split
                # is layout-free; the axis-0 sum is pure VPU adds into
                # acc_rows//8 independent vregs (shallow add chains).
                return acc + jnp.sum(
                    sq.reshape(sub_groups, acc_rows, LANES), axis=0)

            acc0 = jnp.zeros((acc_rows, LANES), jnp.float32)
            return jax.lax.fori_loop(0, num_chunks, chunk_body, acc0)

        if any_mask:
            needs_mask = b >= mask_from_block

            @pl.when(jnp.logical_not(needs_mask))
            def _():
                out_ref[...] += block_sum(False)      # fast path: full blocks

            @pl.when(needs_mask)
            def _():
                out_ref[...] += block_sum(True)       # ragged tail / overflow
        else:
            out_ref[...] += block_sum(False)

    return kernel


def sigmoid_mae_loss(pred, target):
    """SigmoidMAELoss.forward == F.mse_loss(pred, target, reduction='mean').

    NOTE: despite the class name, the reference module's forward() is plain
    MSE (its Sigmoid member is unused) -- do not "fix" this to sigmoid + L1.
    """
    assert pred.shape == target.shape
    n_elem = pred.size
    assert n_elem > 0

    pred_f = jnp.ravel(pred)          # native dtype; f32 cast happens in-kernel
    targ_f = jnp.ravel(target)

    # Lane-dense (rows, 128) slab. A wrapper-side pad (full HBM copy) is only
    # taken for truly ragged sizes (n % 128 != 0) or tiny inputs; the zeros
    # contribute 0 to the sum of squares.
    padded = n_elem
    if padded % LANES != 0:
        padded += LANES - padded % LANES
    if padded < MIN_TILE_ELEMS:
        padded = MIN_TILE_ELEMS
    if padded != n_elem:
        pred_f = jnp.pad(pred_f, (0, padded - n_elem))
        targ_f = jnp.pad(targ_f, (0, padded - n_elem))

    rows = padded // LANES            # >= 8
    pred2d = pred_f.reshape(rows, LANES)
    targ2d = targ_f.reshape(rows, LANES)

    p_sz = jnp.dtype(pred.dtype).itemsize
    t_sz = jnp.dtype(target.dtype).itemsize

    # Byte-targeted block: ~4 MiB of the wider input per grid step so the
    # ~0.35us/step overhead stays small even at v7x HBM bandwidth.
    target_rows = max(ACC_ROWS_MAX,
                      TARGET_BLOCK_BYTES // (LANES * max(p_sz, t_sz)))
    # Split the row range across NUM_SPLITS first (one half per TensorCore on
    # v7x), then tile each half.
    half_rows = pl.cdiv(rows, NUM_SPLITS)
    block_rows = min(target_rows,
                     max(SUBLANES, _round_down(half_rows, SUBLANES)))
    if block_rows >= CHUNK_ROWS:
        block_rows = _round_down(block_rows, CHUNK_ROWS)
        chunk_rows = CHUNK_ROWS
    else:
        chunk_rows = block_rows
    acc_rows = math.gcd(block_rows, ACC_ROWS_MAX)

    total_blocks = pl.cdiv(rows, block_rows)
    blocks_per_split = pl.cdiv(total_blocks, NUM_SPLITS)
    ragged = (rows % block_rows) != 0
    # Only the genuinely partial last block and the (at most one) overflow
    # step pay the row mask; all full blocks take the unmasked fast path.
    mask_from_block = total_blocks - 1 if ragged else total_blocks
    any_mask = mask_from_block < NUM_SPLITS * blocks_per_split

    kernel = _make_mse_sum_kernel(block_rows, chunk_rows, acc_rows,
                                  blocks_per_split, rows, mask_from_block,
                                  any_mask)

    def in_map(c, i):
        # Clamp so the (at most one) overflow step re-reads the last valid
        # block; its contribution is fully masked to zero in-kernel.
        return (jnp.minimum(c * blocks_per_split + i, total_blocks - 1), 0)

    out_bytes = NUM_SPLITS * acc_rows * LANES * 4
    cost = pl.CostEstimate(
        flops=3 * n_elem,                 # sub + mul + add per element
        transcendentals=0,
        bytes_accessed=n_elem * (p_sz + t_sz) + out_bytes,
    )

    partial = pl.pallas_call(
        kernel,
        out_shape=jax.ShapeDtypeStruct((NUM_SPLITS, acc_rows, LANES),
                                       jnp.float32),
        grid_spec=pltpu.PrefetchScalarGridSpec(
            num_scalar_prefetch=0,
            grid=(NUM_SPLITS, blocks_per_split),
            in_specs=[
                pl.BlockSpec((block_rows, LANES), in_map),
                pl.BlockSpec((block_rows, LANES), in_map),
            ],
            out_specs=pl.BlockSpec((None, acc_rows, LANES),
                                   lambda c, i: (c, 0, 0)),
        ),
        compiler_params=pltpu.CompilerParams(
            dimension_semantics=("parallel", "arbitrary"),
            # 2 inputs x 2 pipeline buffers x <=4 MiB = <=16 MiB + headroom;
            # explicit so v5e's 16 MiB scoped default is not a limit.
            vmem_limit_bytes=32 * 1024 * 1024,
        ),
        cost_estimate=cost,
    )(pred2d, targ2d)

    # Single cross-lane/sublane reduction + mean, outside the hot loop. f32
    # accumulation is spread over NUM_SPLITS * acc_rows * 128 lane slots, so
    # precision is fine for realistic sizes.
    return jnp.sum(partial) / jnp.float32(n_elem)


if __name__ == "__main__":
    key = jax.random.PRNGKey(0)

    # 1) Small NCHW-like shape (score maps), f32, exact (rows,128) fit.
    k1, k2 = jax.random.split(key)
    pred = jax.random.normal(k1, (2, 4, 16, 16), dtype=jnp.float32)
    target = jax.random.normal(k2, (2, 4, 16, 16), dtype=jnp.float32)
    loss = jax.block_until_ready(sigmoid_mae_loss(pred, target))
    ref = jnp.mean((pred - target) ** 2)
    assert jnp.allclose(loss, ref, rtol=1e-5, atol=1e-6), (loss, ref)

    # 2) bf16 inputs, multi-block grid (2304 rows), exercises the 2-way split.
    k3, k4 = jax.random.split(k1)
    pred_b = jax.random.normal(k3, (4, 8, 96, 96), dtype=jnp.bfloat16)
    targ_b = jax.random.normal(k4, (4, 8, 96, 96), dtype=jnp.bfloat16)
    loss_b = jax.block_until_ready(sigmoid_mae_loss(pred_b, targ_b))
    ref_b = jnp.mean((pred_b.astype(jnp.float32) - targ_b.astype(jnp.float32)) ** 2)
    assert jnp.allclose(loss_b, ref_b, rtol=1e-3, atol=1e-4), (loss_b, ref_b)

    # 3) Ragged size (n % 1024 != 0): pad-to-128 + masked edge block + the
    #    clamped overflow step of the 2-way split.
    k5, k6 = jax.random.split(k2)
    pred_r = jax.random.normal(k5, (3, 5, 40, 40), dtype=jnp.float32)
    targ_r = jax.random.normal(k6, (3, 5, 40, 40), dtype=jnp.float32)
    loss_r = jax.block_until_ready(sigmoid_mae_loss(pred_r, targ_r))
    ref_r = jnp.mean((pred_r - targ_r) ** 2)
    assert jnp.allclose(loss_r, ref_r, rtol=1e-5, atol=1e-6), (loss_r, ref_r)

    print("KERNEL_OK")
</pallas_src>

<mosaic_0001>
module attributes {stable_mosaic.version = 11 : i64} {
  func.func @kernel(%arg0: i32, %arg1: i32, %arg2: memref<8x128xf32, #tpu.memory_space<vmem>>, %arg3: memref<8x128xf32, #tpu.memory_space<vmem>>, %arg4: memref<1x8x128xf32, #tpu.memory_space<vmem>>) attributes {dimension_semantics = [#tpu.dimension_semantics<parallel>, #tpu.dimension_semantics<arbitrary>], iteration_bounds = array<i64: 2, 1>, scalar_prefetch = 0 : i64, scratch_operands = 0 : i64, tpu.core_type = #tpu.core_type<tc>, window_params = [{transform_indices = @transform_0, window_bounds = array<i64: 8, 128>}, {transform_indices = @transform_1, window_bounds = array<i64: 8, 128>}, {transform_indices = @transform_2, window_bounds = array<i64: 1, 8, 128>}]} {
    %c0_i32 = arith.constant 0 : i32
    %0 = arith.cmpi eq, %arg1, %c0_i32 : i32
    %1 = arith.extui %0 : i1 to i32
    %c0_i32_0 = arith.constant 0 : i32
    %2 = arith.cmpi ne, %1, %c0_i32_0 : i32
    scf.if %2 {
      %cst_10 = arith.constant 0.000000e+00 : f32
      %21 = vector.broadcast %cst_10 : f32 to vector<8x128xf32>
      %c0_11 = arith.constant 0 : index
      %c0_12 = arith.constant 0 : index
      %c0_13 = arith.constant 0 : index
      %22 = vector.load %arg4[%c0_11, %c0_12, %c0_13] : memref<1x8x128xf32, #tpu.memory_space<vmem>>, vector<1x8x128xf32>
      %23 = vector.shape_cast %22 : vector<1x8x128xf32> to vector<8x128xf32>
      %24 = vector.shape_cast %21 : vector<8x128xf32> to vector<1x8x128xf32>
      tpu.vector_store %arg4[%c0_11, %c0_12, %c0_13], %24 {strides = array<i32>} : memref<1x8x128xf32, #tpu.memory_space<vmem>>, vector<1x8x128xf32>,
    } else {
    }
    %c0 = arith.constant 0 : index
    %c0_1 = arith.constant 0 : index
    %c0_2 = arith.constant 0 : index
    %3 = vector.load %arg4[%c0, %c0_1, %c0_2] : memref<1x8x128xf32, #tpu.memory_space<vmem>>, vector<1x8x128xf32>
    %4 = vector.shape_cast %3 : vector<1x8x128xf32> to vector<8x128xf32>
    %cst = arith.constant 0.000000e+00 : f32
    %5 = vector.broadcast %cst : f32 to vector<8x128xf32>
    %c0_i32_3 = arith.constant 0 : i32
    %c8_i32 = arith.constant 8 : i32
    %6 = arith.muli %c0_i32_3, %c8_i32 : i32
    %7 = tpu.assume_multiple %6, 8 : i32
    %8 = arith.index_cast %7 : i32 to index
    %c0_4 = arith.constant 0 : index
    %9 = vector.load %arg2[%8, %c0_4] : memref<8x128xf32, #tpu.memory_space<vmem>>, vector<8x128xf32>
    %10 = arith.index_cast %7 : i32 to index
    %c0_5 = arith.constant 0 : index
    %11 = vector.load %arg3[%10, %c0_5] : memref<8x128xf32, #tpu.memory_space<vmem>>, vector<8x128xf32>
    %12 = arith.subf %9, %11 : vector<8x128xf32>
    %13 = arith.mulf %12, %12 : vector<8x128xf32>
    %14 = vector.shape_cast %13 : vector<8x128xf32> to vector<1x8x128xf32>
    %cst_6 = arith.constant dense<0.000000e+00> : vector<8x128xf32>
    %15 = vector.multi_reduction <add>, %14, %cst_6 [0] : vector<1x8x128xf32> to vector<8x128xf32>
    %16 = arith.addf %5, %15 : vector<8x128xf32>
    %c1_i32 = arith.constant 1 : i32
    %17 = arith.addf %4, %16 : vector<8x128xf32>
    %c0_7 = arith.constant 0 : index
    %c0_8 = arith.constant 0 : index
    %c0_9 = arith.constant 0 : index
    %18 = vector.load %arg4[%c0_7, %c0_8, %c0_9] : memref<1x8x128xf32, #tpu.memory_space<vmem>>, vector<1x8x128xf32>
    %19 = vector.shape_cast %18 : vector<1x8x128xf32> to vector<8x128xf32>
    %20 = vector.shape_cast %17 : vector<8x128xf32> to vector<1x8x128xf32>
    tpu.vector_store %arg4[%c0_7, %c0_8, %c0_9], %20 {strides = array<i32>} : memref<1x8x128xf32, #tpu.memory_space<vmem>>, vector<1x8x128xf32>,
    return
  }
  func.func @transform_0(%arg0: i32, %arg1: i32) -> (i32, i32) {
    %c1_i32 = arith.constant 1 : i32
    %0 = arith.muli %arg0, %c1_i32 : i32
    %1 = arith.addi %0, %arg1 : i32
    %c1_i32_0 = arith.constant 1 : i32
    %2 = arith.minsi %1, %c1_i32_0 : i32
    %c0_i32 = arith.constant 0 : i32
    %c0_i32_1 = arith.constant 0 : i32
    return %2, %c0_i32 : i32, i32
  }
  func.func @transform_1(%arg0: i32, %arg1: i32) -> (i32, i32) {
    %c1_i32 = arith.constant 1 : i32
    %0 = arith.muli %arg0, %c1_i32 : i32
    %1 = arith.addi %0, %arg1 : i32
    %c1_i32_0 = arith.constant 1 : i32
    %2 = arith.minsi %1, %c1_i32_0 : i32
    %c0_i32 = arith.constant 0 : i32
    %c0_i32_1 = arith.constant 0 : i32
    return %2, %c0_i32 : i32, i32
  }
  func.func @transform_2(%arg0: i32, %arg1: i32) -> (i32, i32, i32) {
    %c0_i32 = arith.constant 0 : i32
    %c0_i32_0 = arith.constant 0 : i32
    %c0_i32_1 = arith.constant 0 : i32
    return %arg0, %c0_i32, %c0_i32_0 : i32, i32, i32
  }
}

</mosaic_0001>

<bundles_post_ra>
// kernel: tpu_custom_call.1
= control target key start
LH: loop header
LB: loop body
LE: loop exit
PB: predicated region body
PF: predicated region fallthrough
CT: control target
= control target key end

     0   :  { %s821_s0 = inlined_call_operand.hbm [shape: f32[16,128], index: 0, kind: input, shape index: {}]   ;;  %s822_s1 = inlined_call_operand.hbm [shape: f32[16,128], index: 1, kind: input, shape index: {}]   ;;  %s823_s2 = inlined_call_operand.hbm [shape: f32[2,8,128], index: 2, kind: output, shape index: {}]  }
   0x1   :  { %826 = sst [smem:[#allocation13_spill]] %s821_s0 }
   0x2   :  { %7 = vsyncpa [#allocation3], 0 }
   0x3   :  { %9 = vsyncpa [#allocation3 + $0x1], 0 }
   0x4   :  { %10 = vsyncpa [#allocation6], 0 }
   0x5   :  { %12 = vsyncpa [#allocation6 + $0x1], 0 }
   0x6   :  { %13 = vsyncpa [#allocation4], 0 }
   0x7   :  { %15 = vsyncpa [#allocation4 + $0x1], 0  ;;  %s662_s9 = smov 0   ;;  %s664_s10 = smov 0  }
   0x8   :  { %s666_s11 = smov 0   ;;  %s668_s12 = smov 0  }
   0x9   :  { %s670_s13 = smov 0   ;;  %s672_s14 = smov 0  }
   0xa   :  { %s674_s15 = smov 0   ;;  %s676_s16 = smov 0  }
   0xb   :  { %s678_s17 = smov 0  }
   0xc LB: > { %827 = sst [smem:[#allocation11_spill]] %s641_s16  ;;  %s367_s18 = sadd.s32 4294967295, %s645_s17   ;;  %s645_s17 = sphi %s678_s17, %s21_s17   ;;  %s641_s16 = sphi %s676_s16, %s835_s16   ;;  %s637_s15 = sphi %s674_s15, %s834_s15   ;;  %s633_s14 = sphi %s672_s14, %s841_s14   ;;  %s629_s13 = sphi %s670_s13, %s840_s13   ;;  %s625_s12 = sphi %s668_s12, %s839_s12   ;;  %s621_s11 = sphi %s666_s11, %s838_s11   ;;  %s617_s10 = sphi %s664_s10, %s837_s10   ;;  %s613_s9 = sphi %s662_s9, %s836_s9  }
   0xd   : > { %s368_s19 = sadd.s32 4294967294, %s645_s17   ;;  %s33_s20 = sadd.s32 1, %s641_s16 }
   0xe   : > { %p38_p0 = scmp.lt.s32.totalorder %s641_s16, 1  ;;  %p35_p1 = scmp.ge.s32.totalorder %s33_s20, 2 }
   0xf   : > { %s46_s21 = sadd.s32 1, %s633_s14  ;;  %p53_p2 = scmp.ne.s32.totalorder %s633_s14, %s629_s13 }
  0x10   : > { %s711_s22 = scalar_select %p38_p0, %s641_s16, 1 }
  0x11   : > { %s843_s20 = smov (%p35_p1, %s33_s20), 0  ;;  %p54_p3 = scmp.eq.s32.totalorder %s645_s17, 0 }
  0x12   : > { %828 = sst [smem:[#allocation12_spill]] %s843_s20  ;;  %p41_p4 = scmp.lt.s32.totalorder %s843_s20, 1 }
  0x13   : > { %p59_p5 = scmp.ne.s32.totalorder %s629_s13, %s625_s12  ;;  %p720_p6 = por %p54_p3, %p53_p2 }
  0x14   : > { %p60_p7 = scmp.eq.s32.totalorder %s367_s18, 0  ;;  %s101_s26 = ssub.s32 %s641_s16, %s843_s20 }
  0x15   : > { %s42_s24 = scalar_select %p41_p4, %s843_s20, 1 }
  0x16   : > { %p725_p8 = por %p60_p7, %p59_p5  ;;  %p102_p9 = scmp.eq.s32.totalorder %s101_s26, 0 }
  0x17   : > { %s43_s27 = ssub.s32 %s711_s22, %s42_s24  ;;  %s104_s28 = sadd.s32 1, %s621_s11 }
  0x18   : > { %p44_p10 = scmp.eq.s32.totalorder %s43_s27, 0  ;;  %p114_p11 = scmp.ne.s32.totalorder %s621_s11, %s617_s10 }
  0x19   : > { %s734_s29 = scalar_select %p102_p9, %s621_s11, %s104_s28  }
  0x1a   : > { %s737_s30 = scalar_select %p44_p10, %s633_s14, %s46_s21  }
  0x1b   : > { %p115_p12 = scmp.eq.s32.totalorder %s367_s18, 1  ;;  %p120_p13 = scmp.ne.s32.totalorder %s617_s10, %s613_s9 }
  0x1c   : > { %p121_p0 = scmp.eq.s32.totalorder %s368_s19, 1  ;;  %p370_p2 = scmp.ge.s32.totalorder %s645_s17, 2 }
  0x1d   : > { %p743_p1 = por %p115_p12, %p114_p11  ;;  %p400_p4 = scmp.lt.s32.totalorder %s645_s17, 2 }
  0x1e   : > { %p748_p3 = por %p121_p0, %p120_p13  ;;  %s141_s5 = sand.u32 1, %s633_s14  }
  0x1f   : > { %s372_s6 = sshll.u32 %s711_s22, 3  ;;  %s371_s7 = sshll.u32 %s141_s5, 3 }
  0x20   : > { %s833_s0 = sld [smem:[#allocation13_spill]]  ;;  %s145_s19 = scalar_lea.vmem [#allocation2], %s371_s7 }
  0x21   : > { %s156_s24 = sshll.u32 %s145_s19, 4  ;;  %p390_p5 = pnand %p400_p4, %p720_p6  ;;  %s157_s24 = int_to_ptr.vmem [resolvable:$true] %s156_s24 }
  0x22   : > { %p375_p7 = scmp.ge.s32.totalorder %s645_s17, 1  ;;  %p183_p9 = scmp.lt.s32.totalorder %s645_s17, 3 }
  0x23   : > { %s142_s26 = scalar_lea.sflag [#allocation3], %s141_s5  ;;  %s174_s22 = scalar_lea.hbm %s822_s1, %s372_s6 }
  0x24   : > { %p184_p10 = pnand %p375_p7, %p183_p9  ;;  %s176_s20 = sshll.u32 %s174_s22, 4  ;;  %s177_s20 = int_to_ptr.hbm [resolvable:$true] %s176_s20 }
  0x25   : > { %s167_s16 = scalar_lea.vmem [#allocation5], %s371_s7  ;;  %s164_s12 = scalar_lea.sflag [#allocation6], %s141_s5 }
  0x26   : > { %s152_s18 = scalar_lea.hbm %s833_s0, %s372_s6  ;;  %s178_s8 = sshll.u32 %s167_s16, 4  ;;  %s179_s8 = int_to_ptr.vmem [resolvable:$true] %s178_s8 }
  0x27   : > { %s154_s21 = sshll.u32 %s152_s18, 4  ;;  %187 = sbr.rel (%p184_p10) target bundleno = 64 (0x40), region = 28  ;;  %s155_s21 = int_to_ptr.hbm [resolvable:$true] %s154_s21 }
  0x28   : > { %392 = dma.hbm_to_vmem [thread:$0]  (!%p390_p5), %s155_s21, 128, %s157_s24, %s142_s26  }
  0x29   : > { %395 = dma.hbm_to_vmem [thread:$0]  (!%p390_p5), %s177_s20, 128, %s179_s8, %s164_s12  }
  0x2a   : > { %s189_s23 = sand.u32 (!%p184_p10), 1, %s629_s13  }
  0x2b   : > { %s376_s18 = sshll.u32 (!%p184_p10), %s189_s23, 3  ;;  %s190_s19 = scalar_lea.sflag (!%p184_p10), [#allocation3], %s189_s23 }
  0x2c   : > { %s193_s0 = scalar_lea.vmem [#allocation2], %s376_s18 }
  0x2d   : > { %600 = dma.done.wait (%p725_p8), %s190_s19, 128  }
  0x2e   : > { %602 = vsyncadd (%p725_p8), %s190_s19, 4294967168  ;;  %s200_s6 = scalar_lea.sflag [#allocation6], %s189_s23  ;;  %s203_s7 = scalar_lea.vmem [#allocation5], %s376_s18 }
  0x2f   : > { %604 = dma.done.wait (%p725_p8), %s200_s6, 128  }
  0x30   : > { %606 = vsyncadd (%p725_p8), %s200_s6, 4294967168  ;;  %s227_s16 = sand.u32 1, %s617_s10   ;;  %s380_s5 = sshll.u32 %s637_s15, 3  ;;  %v242_v0 = vld [vmem:[%s193_s0] sm:$0xff]  ;;  %v243_v1 = vld [vmem:[%s203_s7] sm:$0xff] }
  0x31   : > { %s378_s20 = sshll.u32 %s227_s16, 3  ;;  %s261_s26 = scalar_lea.hbm %s823_s2, %s380_s5  ;;  %v244_v2 = vsub.f32 %v242_v0, %v243_v1 }
  0x32   : > { %s229_s27 = scalar_lea.vmem [#allocation7], %s378_s20  ;;  %s265_s22 = sshll.u32 %s261_s26, 4  ;;  %s266_s22 = int_to_ptr.hbm [resolvable:$true] %s265_s22 }
  0x33   : > { %s263_s28 = sshll.u32 %s229_s27, 4  ;;  %v245_v3 = vmul.f32 %v244_v2, %v244_v2  ;;  %s251_s25 = scalar_lea.sflag [#allocation4], %s227_s16  ;;  %s264_s28 = int_to_ptr.vmem [resolvable:$true] %s263_s28 }
  0x34   : > { %s549_s8 = sshra.s32 %s266_s22, 4  ;;  %s555_s0 = scalar_lea.hbm %s823_s2, 16  ;;  %s550_s8 = int_to_ptr.hbm [resolvable:$true] %s549_s8 }
  0x35   : > { %249 = vst [vmem:[%s229_s27] sm:$0xff] %v245_v3  ;;  %s551_s12 = scalar_lea.hbm %s550_s8, 8  ;;  %p556_p12 = scmp.lt.s32.totalorder %s550_s8, %s823_s2 }
  0x36   : > { %p552_p6 = scmp.ne.s32.totalorder %s550_s8, %s551_s12  ;;  %p557_p13 = scmp.lt.s32.totalorder %s555_s0, %s551_s12 }
  0x38   : > { %p553_p8 = pnand %p552_p6, %p743_p1  ;;  %p558_p0 = por %p557_p13, %p556_p12 }
  0x3a   : > { %p554_p11 = pneg %p553_p8 }
  0x3c   : > { %p559_p4 = pnand %p558_p0, %p554_p11 }
  0x3e   : > { %562 = shalt.err (!%p559_p4)
}
  0x3f   : > { %387 = dma.vmem_to_hbm [thread:$0]  (%p743_p1), %s264_s28, 128, %s266_s22, %s251_s25  }
  0x40 PF: > { %s277_s6 = sand.u32 1, %s613_s9   ;;  %p397_p5 = pnand %p370_p2, %p748_p3 }
  0x41   : > { %s278_s7 = scalar_lea.sflag [#allocation4], %s277_s6 }
  0x42   : > { %p398_p7 = pneg %p397_p5 }
  0x44   : > { %608 = dma.done.wait (%p398_p7), %s278_s7, 128  }
  0x45   : > { %610 = vsyncadd (%p398_p7), %s278_s7, 4294967168  ;;  %s21_s17 = sadd.s32 1, %s645_s17   ;;  %s834_s15 = sld [smem:[#allocation11_spill]] }
  0x46   : > { %p18_p9 = scmp.ge.s32.totalorder %s21_s17, 4   ;;  %s835_s16 = sld [smem:[#allocation12_spill]] }
  0x47   : > { %s836_s9 = smov %s617_s10  ;;  %s837_s10 = smov %s621_s11 }
  0x48   : > { %s838_s11 = smov %s734_s29  ;;  %s839_s12 = smov %s629_s13 }
  0x49   : > { %s840_s13 = smov %s633_s14  ;;  %s841_s14 = smov %s737_s30 }
  0x4a   :  { %20 = sbr.rel (!%p18_p9) target bundleno = 12 (0xc), region = 90 }
  0x4f   :  { %284 = vsyncpa [#allocation3], 1 }
  0x50   :  { %286 = vsyncpa [#allocation3 + $0x1], 1 }
  0x51   :  { %287 = vsyncpa [#allocation6], 1 }
  0x52   :  { %289 = vsyncpa [#allocation6 + $0x1], 1 }
  0x53   :  { %290 = vsyncpa [#allocation4], 1 }
  0x54   :  { %292 = vsyncpa [#allocation4 + $0x1], 1 }

</bundles_post_ra>
